<compile_context>
chip_gen: v6e
topology: v6e:2x2x1
jax: 0.10.0
libtpu: 0.0.40
codegen_flags: <defaults>
</compile_context>

<pallas_src>
import jax
import jax.numpy as jnp
from jax.experimental import pallas as pl
from jax.experimental.pallas import tpu as pltpu


def _round_up(x: int, m: int) -> int:
    return ((x + m - 1) // m) * m


def _fill_kernel(fill_ref, out_ref):
    """Broadcast the SMEM scalar fill value into a dense (block_rows, 128) tile."""
    out_ref[...] = jnp.full(out_ref.shape, fill_ref[0], dtype=out_ref.dtype)


class DummyClassifierSinglePallas:
    """JAX/Pallas port of TorchDummyClassifierSingle (forward == predict)."""

    # Tunables (see module docstring): rows of 128 int32 lanes per output block.
    _TILE_ROWS = 2048        # 2048 * 128 * 4 B = 1 MiB per block (2 MiB double-buffered)
    _MIN_PALLAS_N = 1024     # below this, launch overhead dominates -> plain jnp.full

    def __init__(self, classes, class_prior, strategy, constant):
        assert strategy in ["most_frequent", "prior", "stratified",
                            "uniform", "constant"]
        self.classes = jnp.asarray(classes, dtype=jnp.int32).reshape(-1)        # (C,)
        self.class_prior = jnp.asarray(class_prior, dtype=jnp.float32).reshape(-1)  # (C,)
        self.strategy = strategy
        self.constant = jnp.asarray(constant, dtype=jnp.int32).reshape(-1)[:1]  # (1,)

    def __call__(self, x):
        return self.predict(x)

    # --- class selection, hoisted out of the per-tile kernel path -------------
    def _fill_value(self):
        """The single label that predict() repeats N times, as a (1,) int32."""
        if self.strategy in ("most_frequent", "prior"):
            # classes[class_prior.argmax()]; ties -> first occurrence.
            return self.classes[jnp.argmax(self.class_prior)].reshape(1)
        # 'constant' strategy: constant.view(1)
        return self.constant

    # --- forward ---------------------------------------------------------------
    def predict(self, x):
        if self.strategy in ("stratified", "uniform"):
            # TODO(synk): stratified / uniform require torch-equivalent RNG sampling.
            raise NotImplementedError(
                f"strategy {self.strategy!r} (random sampling) not implemented")

        n = int(x.shape[0])
        fill = self._fill_value()                       # (1,) int32

        if n == 0:
            return jnp.zeros((0,), dtype=jnp.int32)

        if n < self._MIN_PALLAS_N:
            # Kernel-launch overhead dwarfs the work at tiny N; plain XLA fill.
            return jnp.full((n,), fill[0], dtype=jnp.int32)

        # Lane+sublane dense output slab: (padded_rows, 128) int32, tiled over rows.
        rows = -(-n // 128)                              # ceil(n / 128)
        block_rows = min(self._TILE_ROWS, _round_up(rows, 8))
        num_tiles = -(-rows // block_rows)               # ceil(rows / block_rows)
        padded_rows = num_tiles * block_rows

        out = pl.pallas_call(
            _fill_kernel,
            out_shape=jax.ShapeDtypeStruct((padded_rows, 128), jnp.int32),
            grid=(num_tiles,),
            in_specs=[
                # single scalar, resident in SMEM for the whole grid (no per-tile DMA)
                pl.BlockSpec(memory_space=pltpu.MemorySpace.SMEM),
            ],
            out_specs=pl.BlockSpec((block_rows, 128), lambda i: (i, 0)),
            compiler_params=pltpu.CompilerParams(
                dimension_semantics=("parallel",)),      # shards across TCs on v7x
        )(fill)

        # Padding tail holds the same fill value; slice back to exactly N.
        return out.reshape(-1)[:n]


if __name__ == "__main__":
    key = jax.random.PRNGKey(0)
    k_prior, k_x = jax.random.split(key)

    C, D = 4, 32
    N_BIG = 2052      # > _MIN_PALLAS_N and not a multiple of 128 -> pad + slice path
    N_SMALL = 8       # < _MIN_PALLAS_N -> plain-JAX short-circuit path

    classes = jnp.arange(C, dtype=jnp.int32)                                   # [0,1,2,3]
    class_prior = jax.nn.softmax(jax.random.normal(k_prior, (C,), dtype=jnp.float32))
    constant = classes[1]

    x_big = jax.random.normal(k_x, (N_BIG, D), dtype=jnp.float32)
    x_small = x_big[:N_SMALL]

    # 'prior' strategy -> Pallas fill kernel path.
    model = DummyClassifierSinglePallas(classes, class_prior, "prior", constant)
    pred = jax.block_until_ready(model(x_big))
    ref_label = classes[jnp.argmax(class_prior)]
    assert pred.shape == (N_BIG,) and pred.dtype == jnp.int32
    assert bool(jnp.all(pred == ref_label))

    # 'constant' strategy -> Pallas fill kernel path.
    model_c = DummyClassifierSinglePallas(classes, class_prior, "constant", constant)
    pred_c = jax.block_until_ready(model_c(x_big))
    assert pred_c.shape == (N_BIG,)
    assert bool(jnp.all(pred_c == constant))

    # tiny-N short-circuit path (no kernel launch), same semantics.
    pred_s = jax.block_until_ready(model(x_small))
    assert pred_s.shape == (N_SMALL,)
    assert bool(jnp.all(pred_s == ref_label))

    print("KERNEL_OK")
</pallas_src>

<mosaic_0001>
module attributes {stable_mosaic.version = 11 : i64} {
  func.func @_fill_kernel(%arg0: i32, %arg1: memref<1xi32, #tpu.memory_space<smem>>, %arg2: memref<24x128xi32, #tpu.memory_space<vmem>>) attributes {dimension_semantics = [#tpu.dimension_semantics<parallel>], iteration_bounds = array<i64: 1>, scalar_prefetch = 0 : i64, scratch_operands = 0 : i64, tpu.core_type = #tpu.core_type<tc>, window_params = [{transform_indices = @transform_0, window_bounds = array<i64: 1>}, {transform_indices = @transform_1, window_bounds = array<i64: 24, 128>}]} {
    %c0 = arith.constant 0 : index
    %0 = memref.load %arg1[%c0] : memref<1xi32, #tpu.memory_space<smem>>
    %1 = vector.broadcast %0 : i32 to vector<24x128xi32>
    %c0_0 = arith.constant 0 : index
    %c0_1 = arith.constant 0 : index
    %2 = vector.load %arg2[%c0_0, %c0_1] : memref<24x128xi32, #tpu.memory_space<vmem>>, vector<24x128xi32>
    tpu.vector_store %arg2[%c0_0, %c0_1], %1 {strides = array<i32>} : memref<24x128xi32, #tpu.memory_space<vmem>>, vector<24x128xi32>,
    return
  }
  func.func @transform_0(%arg0: i32) -> i32 {
    %c0_i32 = arith.constant 0 : i32
    %c0_i32_0 = arith.constant 0 : i32
    return %c0_i32 : i32
  }
  func.func @transform_1(%arg0: i32) -> (i32, i32) {
    %c0_i32 = arith.constant 0 : i32
    %c0_i32_0 = arith.constant 0 : i32
    return %arg0, %c0_i32 : i32, i32
  }
}

</mosaic_0001>

<bundles_post_ra>
// kernel: tpu_custom_call.1
= control target key start
LH: loop header
LB: loop body
LE: loop exit
PB: predicated region body
PF: predicated region fallthrough
CT: control target
= control target key end

     0   :  { %s75_s0 = inlined_call_operand.<no memory space> [shape: s32[1], index: 0, kind: input, shape index: {}]   ;;  %s76_s1 = inlined_call_operand.hbm [shape: s32[24,128], index: 1, kind: output, shape index: {}]  }
   0x1   :  { %v11_v0 = vstv %s75_s0 }
   0x2   :  { %7 = vsyncpa [#allocation4], 0  ;;  %12 = vst [vmem:[#allocation3] sm:$0xff] %v11_v0  ;;  %s56_s8 = smov [#allocation3]  }
   0x3   :  { %13 = vst [vmem:[#allocation3 + $0x8] sm:$0xff] %v11_v0  ;;  %14 = vst [vmem:[#allocation3 + $0x10] sm:$0xff] %v11_v0  ;;  %s20_s9 = sshll.u32 %s56_s8, 4  ;;  %s21_s9 = int_to_ptr.vmem [resolvable:$true] %s20_s9 }
   0x4   :  { %s34_s10 = scalar_lea.vmem %s21_s9, 384  ;;  %p39_p1 = scmp.lt.s32.totalorder %s21_s9, %s21_s9 }
   0x5   :  { %p35_p0 = scmp.ne.s32.totalorder %s21_s9, %s34_s10  ;;  %p40_p2 = scmp.lt.s32.totalorder %s34_s10, %s34_s10 }
   0x7   :  { %p41_p3 = por %p40_p2, %p39_p1 }
   0x9   :  { %p42_p4 = pnand %p41_p3, %p35_p0 }
   0xb   :  { %45 = shalt.err (!%p42_p4)
}
   0xc   :  { %s57_s11 = smov 128   ;;  %s58_s12 = smov 8  }
   0xd   :  { %26 = dma.vmem_to_hbm [thread:$0]  %s21_s9, 384, %s76_s1, [#allocation4], %s57_s11, %s57_s11, %s58_s12  }
   0xe   :  { %54 = dma.done.wait [#allocation4], 384  }
   0xf   :  { %55 = vsyncadd [#allocation4], 4294966912 }
  0x10   :  { %30 = vsyncpa [#allocation4], 1 }

</bundles_post_ra>
